<compile_context>
chip_gen: v6e
topology: v6e:2x2x1
jax: 0.10.0
libtpu: 0.0.40
codegen_flags: <defaults>
</compile_context>

<pallas_src>
import functools

import jax
import jax.numpy as jnp
from jax.experimental import pallas as pl
from jax.experimental.pallas import tpu as pltpu


def _dueling_kernel(x_ref, w1_ref, b1_ref, wht_ref, bht_ref, out_ref):
    # Shared layer: (tb, In) @ (In, H) + b1, ReLU; f32 MXU accumulation.
    h = jnp.dot(x_ref[...], w1_ref[...], preferred_element_type=jnp.float32)
    h = jnp.maximum(h + b1_ref[...], 0.0)                        # (tb, H)
    # Folded dueling head, lane-dense output:
    #   out^T = W_head^T @ h^T  via dot_general contracting over H
    #   (lhs (2, H) x rhs (tb, H) -> (2, tb)); avoids an in-kernel transpose.
    out_t = jax.lax.dot_general(
        wht_ref[...], h,
        dimension_numbers=(((1,), (1,)), ((), ())),
        preferred_element_type=jnp.float32,
    )                                                            # (2, tb)
    out_ref[...] = out_t + bht_ref[...]                          # (2,1) broadcasts on lanes


def fold_head_params(params):
    """One-time fold of value/advantage heads + dueling combine (exact algebra).

    Call once when parameters change, NOT per forward; keeps the tiny fold
    matmuls off the hot path.
    """
    wv, bv = params["wv"], params["bv"]          # (H, 1), (1, 1)
    wa, ba = params["wa"], params["ba"]          # (H, 2), (1, 2)
    ones2 = jnp.ones((1, 2), jnp.float32)
    m = jnp.eye(2, dtype=jnp.float32) - 0.5      # I - mean-subtraction matrix
    w_head = wv @ ones2 + wa @ m                 # (H, 2)
    b_head = bv @ ones2 + ba @ m                 # (1, 2)
    return {
        "w1": params["w1"],                      # (In, H)
        "b1": params["b1"],                      # (1, H)
        "wh_t": jnp.asarray(w_head.T),           # (2, H)  pre-transposed head weight
        "bh_t": jnp.asarray(b_head.T),           # (2, 1)  pre-transposed head bias
    }


def _round_up(v, m):
    return ((v + m - 1) // m) * m


@functools.partial(jax.jit, static_argnames=("batch_tile",))
def postponement_value_network(x, folded, *, batch_tile=8192):
    """x: (B, input_size) float32. folded: output of fold_head_params. Returns (B, 2)."""
    B, in_dim = x.shape
    w1, b1 = folded["w1"], folded["b1"]
    wh_t, bh_t = folded["wh_t"], folded["bh_t"]
    hidden = w1.shape[1]

    batch_tile = max(128, _round_up(batch_tile, 128))
    if B <= 256:
        # Small batch: single whole-array block (always legal under the (8,128)
        # rule because block dims equal the full array dims; no padding ops).
        tb = B
    else:
        # >= 2 tiles so both v7x TensorCores get work; tb multiple of 128 keeps
        # the lane-dense (2, tb) out block legal and lets Pallas mask the ragged
        # last block instead of a jnp.pad round-trip.
        tb = min(batch_tile, _round_up((B + 1) // 2, 128))
    grid = (pl.cdiv(B, tb),)

    out_t = pl.pallas_call(
        _dueling_kernel,
        out_shape=jax.ShapeDtypeStruct((2, B), jnp.float32),
        grid_spec=pltpu.PrefetchScalarGridSpec(
            num_scalar_prefetch=0,
            grid=grid,
            in_specs=[
                pl.BlockSpec((tb, in_dim), lambda i: (i, 0)),       # x: tiled over batch
                pl.BlockSpec((in_dim, hidden), lambda i: (0, 0)),   # W1: resident
                pl.BlockSpec((1, hidden), lambda i: (0, 0)),        # b1: resident
                pl.BlockSpec((2, hidden), lambda i: (0, 0)),        # W_head^T: resident
                pl.BlockSpec((2, 1), lambda i: (0, 0)),             # b_head^T: resident
            ],
            out_specs=pl.BlockSpec((2, tb), lambda i: (0, i)),      # lane-dense out^T
        ),
        compiler_params=pltpu.CompilerParams(
            dimension_semantics=("parallel",),      # shard batch tiles across TCs (v7x)
            vmem_limit_bytes=48 * 1024 * 1024,      # headroom for tb=8192..16384 tiles
        ),
    )(x, w1, b1, wh_t, bh_t)
    return out_t.T                                  # tiny (2, B) -> (B, 2) transpose


def init_params(key, input_size, hidden_size=128):
    """Deterministic PyTorch-Linear-style init (uniform(-1/sqrt(fan_in), +1/sqrt(fan_in)))."""
    ks = jax.random.split(key, 6)

    def linear(kw, kb, fan_in, fan_out):
        bound = 1.0 / jnp.sqrt(jnp.float32(fan_in))
        w = jax.random.uniform(kw, (fan_in, fan_out), jnp.float32, -bound, bound)
        b = jax.random.uniform(kb, (1, fan_out), jnp.float32, -bound, bound)
        return w, b

    w1, b1 = linear(ks[0], ks[1], input_size, hidden_size)
    wv, bv = linear(ks[2], ks[3], hidden_size, 1)
    wa, ba = linear(ks[4], ks[5], hidden_size, 2)
    return {"w1": w1, "b1": b1, "wv": wv, "bv": bv, "wa": wa, "ba": ba}


def reference_forward(x, p):
    # Pure-JAX reference with the UNFOLDED head (matches the PyTorch module exactly),
    # computed at HIGHEST precision, so it also validates the head-folding refactor.
    hp = jax.lax.Precision.HIGHEST
    h = jnp.maximum(jnp.dot(x, p["w1"], precision=hp) + p["b1"], 0.0)
    v = jnp.dot(h, p["wv"], precision=hp) + p["bv"]
    a = jnp.dot(h, p["wa"], precision=hp) + p["ba"]
    return v + (a - jnp.mean(a, axis=1, keepdims=True))


if __name__ == "__main__":
    key = jax.random.PRNGKey(0)
    k_x, k_x2, k_p = jax.random.split(key, 3)

    input_size, hidden_size = 32, 128
    params = init_params(k_p, input_size, hidden_size)
    folded = fold_head_params(params)          # fold ONCE, off the hot path
    folded = jax.tree_util.tree_map(jax.block_until_ready, folded)

    # Tolerance covers the MXU's reduced-precision f32 passes vs the HIGHEST-precision
    # reference (kernel compute order also differs due to the folded head).
    ATOL, RTOL = 5e-3, 5e-3

    # Case 1: small batch (single whole-array block).
    batch = 8
    x = jax.random.normal(k_x, (batch, input_size), jnp.float32)
    out = jax.block_until_ready(postponement_value_network(x, folded))
    ref = reference_forward(x, params)
    assert out.shape == (batch, 2)
    assert jnp.allclose(out, ref, atol=ATOL, rtol=RTOL), "mismatch vs reference (B=8)"

    # Case 2: multi-tile grid with a ragged last block (exercises OOB masking path
    # that replaced the jnp.pad / out[:B] round-trip).
    batch2 = 300
    x2 = jax.random.normal(k_x2, (batch2, input_size), jnp.float32)
    out2 = jax.block_until_ready(postponement_value_network(x2, folded))
    ref2 = reference_forward(x2, params)
    assert out2.shape == (batch2, 2)
    assert jnp.allclose(out2, ref2, atol=ATOL, rtol=RTOL), "mismatch vs reference (B=300)"

    print("KERNEL_OK")
</pallas_src>

<mosaic_0001>
module attributes {stable_mosaic.version = 11 : i64} {
  func.func @_dueling_kernel(%arg0: i32, %arg1: memref<8x32xf32, #tpu.memory_space<vmem>>, %arg2: memref<32x128xf32, #tpu.memory_space<vmem>>, %arg3: memref<1x128xf32, #tpu.memory_space<vmem>>, %arg4: memref<2x128xf32, #tpu.memory_space<vmem>>, %arg5: memref<2x1xf32, #tpu.memory_space<vmem>>, %arg6: memref<2x8xf32, #tpu.memory_space<vmem>>) attributes {dimension_semantics = [#tpu.dimension_semantics<parallel>], iteration_bounds = array<i64: 1>, scalar_prefetch = 0 : i64, scratch_operands = 0 : i64, tpu.core_type = #tpu.core_type<tc>, window_params = [{transform_indices = @transform_0, window_bounds = array<i64: 8, 32>}, {pipeline_mode = #tpu.pipeline_mode<synchronous>, transform_indices = @transform_1, window_bounds = array<i64: 32, 128>}, {pipeline_mode = #tpu.pipeline_mode<synchronous>, transform_indices = @transform_2, window_bounds = array<i64: 1, 128>}, {pipeline_mode = #tpu.pipeline_mode<synchronous>, transform_indices = @transform_3, window_bounds = array<i64: 2, 128>}, {pipeline_mode = #tpu.pipeline_mode<synchronous>, transform_indices = @transform_4, window_bounds = array<i64: 2, 1>}, {transform_indices = @transform_5, window_bounds = array<i64: 2, 8>}]} {
    %c0 = arith.constant 0 : index
    %c0_0 = arith.constant 0 : index
    %0 = vector.load %arg1[%c0, %c0_0] : memref<8x32xf32, #tpu.memory_space<vmem>>, vector<8x32xf32>
    %c0_1 = arith.constant 0 : index
    %c0_2 = arith.constant 0 : index
    %1 = vector.load %arg2[%c0_1, %c0_2] : memref<32x128xf32, #tpu.memory_space<vmem>>, vector<32x128xf32>
    %cst = arith.constant dense<0.000000e+00> : vector<8x128xf32>
    %2 = tpu.matmul %0, %1, %cst {dimension_numbers = #tpu.dot_dimension_numbers<[1], [0], [0], [1], [0, 0, 1, 1], [], []>} : vector<8x32xf32>, vector<32x128xf32>, vector<8x128xf32> -> vector<8x128xf32>
    %c0_3 = arith.constant 0 : index
    %c0_4 = arith.constant 0 : index
    %3 = vector.load %arg3[%c0_3, %c0_4] : memref<1x128xf32, #tpu.memory_space<vmem>>, vector<1x128xf32>
    %4 = vector.broadcast %3 : vector<1x128xf32> to vector<8x128xf32>
    %5 = arith.addf %2, %4 : vector<8x128xf32>
    %cst_5 = arith.constant 0.000000e+00 : f32
    %6 = vector.broadcast %cst_5 : f32 to vector<8x128xf32>
    %7 = arith.maximumf %5, %6 : vector<8x128xf32>
    %c0_6 = arith.constant 0 : index
    %c0_7 = arith.constant 0 : index
    %8 = vector.load %arg4[%c0_6, %c0_7] : memref<2x128xf32, #tpu.memory_space<vmem>>, vector<2x128xf32>
    %cst_8 = arith.constant dense<0.000000e+00> : vector<2x8xf32>
    %9 = tpu.matmul %8, %7, %cst_8 {dimension_numbers = #tpu.dot_dimension_numbers<[1], [1], [0], [0], [0, 0, 1, 0], [], []>} : vector<2x128xf32>, vector<8x128xf32>, vector<2x8xf32> -> vector<2x8xf32>
    %c0_9 = arith.constant 0 : index
    %c0_10 = arith.constant 0 : index
    %10 = vector.load %arg5[%c0_9, %c0_10] : memref<2x1xf32, #tpu.memory_space<vmem>>, vector<2x1xf32>
    %11 = vector.broadcast %10 : vector<2x1xf32> to vector<2x8xf32>
    %12 = arith.addf %9, %11 : vector<2x8xf32>
    %c0_11 = arith.constant 0 : index
    %c0_12 = arith.constant 0 : index
    %13 = vector.load %arg6[%c0_11, %c0_12] : memref<2x8xf32, #tpu.memory_space<vmem>>, vector<2x8xf32>
    tpu.vector_store %arg6[%c0_11, %c0_12], %12 {strides = array<i32>} : memref<2x8xf32, #tpu.memory_space<vmem>>, vector<2x8xf32>,
    return
  }
  func.func @transform_0(%arg0: i32) -> (i32, i32) {
    %c0_i32 = arith.constant 0 : i32
    %c0_i32_0 = arith.constant 0 : i32
    return %arg0, %c0_i32 : i32, i32
  }
  func.func @transform_1(%arg0: i32) -> (i32, i32) {
    %c0_i32 = arith.constant 0 : i32
    %c0_i32_0 = arith.constant 0 : i32
    %c0_i32_1 = arith.constant 0 : i32
    return %c0_i32, %c0_i32_0 : i32, i32
  }
  func.func @transform_2(%arg0: i32) -> (i32, i32) {
    %c0_i32 = arith.constant 0 : i32
    %c0_i32_0 = arith.constant 0 : i32
    %c0_i32_1 = arith.constant 0 : i32
    return %c0_i32, %c0_i32_0 : i32, i32
  }
  func.func @transform_3(%arg0: i32) -> (i32, i32) {
    %c0_i32 = arith.constant 0 : i32
    %c0_i32_0 = arith.constant 0 : i32
    %c0_i32_1 = arith.constant 0 : i32
    return %c0_i32, %c0_i32_0 : i32, i32
  }
  func.func @transform_4(%arg0: i32) -> (i32, i32) {
    %c0_i32 = arith.constant 0 : i32
    %c0_i32_0 = arith.constant 0 : i32
    %c0_i32_1 = arith.constant 0 : i32
    return %c0_i32, %c0_i32_0 : i32, i32
  }
  func.func @transform_5(%arg0: i32) -> (i32, i32) {
    %c0_i32 = arith.constant 0 : i32
    %c0_i32_0 = arith.constant 0 : i32
    return %c0_i32, %arg0 : i32, i32
  }
}

</mosaic_0001>

<bundles_post_ra>
// kernel: postponement_value_network.1
= control target key start
LH: loop header
LB: loop body
LE: loop exit
PB: predicated region body
PF: predicated region fallthrough
CT: control target
= control target key end

     0   :  { %10 = vsyncpa [#allocation3], 0  ;;  %s385_s0 = inlined_call_operand.hbm [shape: f32[8,32], index: 0, kind: input, shape index: {}]   ;;  %s386_s1 = inlined_call_operand.hbm [shape: f32[32,128], index: 1, kind: input, shape index: {}]   ;;  %s387_s2 = inlined_call_operand.vmem [shape: f32[1,128], index: 2, kind: input, shape index: {}]   ;;  %s388_s3 = inlined_call_operand.vmem [shape: f32[2,128], index: 3, kind: input, shape index: {}]   ;;  %s389_s4 = inlined_call_operand.vmem [shape: f32[2,1], index: 4, kind: input, shape index: {}]   ;;  %s390_s5 = inlined_call_operand.hbm [shape: f32[2,8], index: 5, kind: output, shape index: {}]  }
   0x1   :  { %11 = vsyncpa [#allocation6], 0 }
   0x2   :  { %12 = vsyncpa [#allocation4], 0  ;;  %s329_s18 = smov [#allocation2]   ;;  %s330_s20 = smov [#allocation5]  }
   0x3   :  { %s19_s19 = sshll.u32 %s329_s18, 4  ;;  %s28_s21 = sshll.u32 %s330_s20, 4  ;;  %s20_s19 = int_to_ptr.vmem [resolvable:$true] %s19_s19  ;;  %s29_s21 = int_to_ptr.vmem [resolvable:$true] %s28_s21 }
   0x4   :  { %s271_s22 = scalar_lea.vmem %s20_s19, 128  ;;  %p276_p1 = scmp.lt.s32.totalorder %s20_s19, %s20_s19 }
   0x5   :  { %p272_p0 = scmp.ne.s32.totalorder %s20_s19, %s271_s22  ;;  %p277_p2 = scmp.lt.s32.totalorder %s271_s22, %s271_s22 }
   0x7   :  { %p278_p3 = por %p277_p2, %p276_p1 }
   0x9   :  { %p279_p4 = pnand %p278_p3, %p272_p0 }
   0xb   :  { %282 = shalt.err (!%p279_p4)
}
   0xc   :  { %22 = dma.hbm_to_vmem [thread:$0]  %s385_s0, 128, %s20_s19, [#allocation3]  }
   0xd   :  { %s291_s25 = scalar_lea.vmem %s29_s21, 512  ;;  %p296_p6 = scmp.lt.s32.totalorder %s29_s21, %s29_s21 }
   0xe   :  { %p292_p5 = scmp.ne.s32.totalorder %s29_s21, %s291_s25  ;;  %p297_p7 = scmp.lt.s32.totalorder %s291_s25, %s291_s25 }
  0x10   :  { %p298_p8 = por %p297_p7, %p296_p6 }
  0x12   :  { %p299_p9 = pnand %p298_p8, %p292_p5 }
  0x14   :  { %302 = shalt.err (!%p299_p9)
}
  0x15   :  { %s331_s26 = smov 128   ;;  %s332_s27 = smov 8  }
  0x16   :  { %34 = dma.hbm_to_vmem [thread:$0]  %s386_s1, 512, %s29_s21, [#allocation6], %s331_s26, %s331_s26, %s332_s27  }
  0x17   :  { %323 = dma.done.wait [#allocation3], 128  }
  0x18   :  { %324 = vsyncadd [#allocation3], 4294967168 }
  0x19   :  { %325 = dma.done.wait [#allocation6], 512  }
  0x1a   :  { %326 = vsyncadd [#allocation6], 4294966784  ;;  %v333_v0 = vmov 0.0   ;;  %vm334_vm0 = vmmov 0   ;;  %v51_v1 = vld [vmem:[#allocation5 + $0x18] sm:$0xff]  ;;  %v50_v2 = vld [vmem:[#allocation5 + $0x10] sm:$0xff] }
  0x1b   :  { %238 = vmatprep.subr.mxu0 %v333_v0  ;;  %246 = vmatprep.mubr.msk.f32.mxu0 %vm334_vm0, %v333_v0  ;;  %v49_v3 = vld [vmem:[#allocation5 + $0x8] sm:$0xff]  ;;  %v48_v4 = vld [vmem:[#allocation5] sm:$0xff]  ;;  %v47_v5 = vld [vmem:[#allocation2] sm:$0xff]  ;;  %vm59_vm1 = vcmask 261120   ;;  %v335_v7 = vmov 0   ;;  %s336_s9 = smov [#allocation7]  }
  0x1c   :  { %249 = vmatprep.subr.mxu1 %v333_v0  ;;  %251 = vmatprep.mubr.msk.f32.mxu1 %vm334_vm0, %v333_v0  ;;  %v135_v6 = vld [vmem:[%s389_s4] sm:$0x3]  ;;  %s219_s4 = sshll.u32 %s336_s9, 4  ;;  %vm211_vm2 = vcmask 58368   ;;  %s220_s4 = int_to_ptr.vmem [resolvable:$true] %s219_s4 }
  0x1d   :  { %239 = vmatpush3.msra.mxu0 %v51_v1  ;;  %262 = vset.pattern.permute.xlu0 %v335_v7  ;;  %v229_v8 = vld [vmem:[%s387_s2] ss:$0 sm:$0xff]  ;;  %s303_s2 = scalar_lea.vmem %s220_s4, 32  ;;  %p308_p11 = scmp.lt.s32.totalorder %s220_s4, %s220_s4 }
  0x1e   :  { %240 = vmatprep.subr.mxu0 %v333_v0  ;;  %138 = vperm.xlu0 %262, %v135_v6   ;;  %v134_v13 = vld [vmem:[%s388_s3] sm:$0x3]  ;;  %p304_p10 = scmp.ne.s32.totalorder %s220_s4, %s303_s2  ;;  %p309_p12 = scmp.lt.s32.totalorder %s303_s2, %s303_s2 }
  0x1f   :  { %241 = vmatpush3.msra.mxu0 %v50_v2 }
  0x20   :  { %242 = vmatprep.subr.mxu0 %v333_v0  ;;  %p310_p13 = por %p309_p12, %p308_p11 }
  0x21   :  { %243 = vmatpush3.msra.mxu0 %v49_v3 }
  0x22   :  { %244 = vmatprep.subr.mxu0 %v333_v0  ;;  %p311_p0 = pnand %p310_p13, %p304_p10 }
  0x23   :  { %245 = vmatpush3.msra.mxu0 %v48_v4 }
  0x24   :  { %247 = vmatmul.mubr.msk.f32.vlgmr.msra.gmra.mxu0 %vm59_vm1, %v47_v5 }
  0x99   :  { %v139_v14 = vpop.permute.xlu0 %138 }
  0xe4   :  { %v129_v9 = vpop.f32.mrf.mxu0 }
  0xe5   :  { %v130_v10 = vadd.f32 %v229_v8, %v129_v9 }
  0xe6   :  { %v248_v11 = vpop.f32.mrf.mxu0 }
  0xe7   :  { %v133_v12 = vmax.f32 %v130_v10, 0.0 }
  0xe9   :  { %250 = vmatpush3.xpose.msra.mxu1 %v133_v12 }
  0xec   :  { %252 = vmatmul.mubr.f32.vlgmr.msra.gmra.mxu1 %v134_v13 }
 0x1ac   :  { %v207_v15 = vpop.f32.mrf.mxu1 }
 0x1ad   :  { %v208_v16 = vadd.f32 %v207_v15, %v139_v14 }
 0x1ae   :  { %v253_v17 = vpop.f32.mrf.mxu1 }
 0x1af   :  { %212 = vst.msk [vmem:[#allocation7] sm:$0x3] %vm211_vm2, %v208_v16 }
 0x1b0   :  { %314 = shalt.err (!%p311_p0)
}
 0x1b1   :  { %222 = dma.vmem_to_hbm [thread:$0]  %s220_s4, 32, %s390_s5, [#allocation4]  }
 0x1b2   :  { %327 = dma.done.wait [#allocation4], 32  }
 0x1b3   :  { %328 = vsyncadd [#allocation4], 4294967264 }
 0x1b4   :  { %226 = vsyncpa [#allocation3], 1 }
 0x1b5   :  { %227 = vsyncpa [#allocation6], 1 }
 0x1b6   :  { %228 = vsyncpa [#allocation4], 1 }

</bundles_post_ra>
